<compile_context>
chip_gen: v5e
topology: v5e:2x2
jax: 0.10.0
libtpu: 0.0.40
codegen_flags: <defaults>
</compile_context>

<pallas_src>
import functools

import jax
import jax.numpy as jnp
from jax import lax
from jax.experimental import pallas as pl
from jax.experimental.pallas import tpu as pltpu


def _round_up(x: int, m: int) -> int:
    return ((x + m - 1) // m) * m


def _mmd_tile_kernel(inv_bw_ref, x_ref, y_ref, xn_ref, yn_ref, out_ref, *,
                     batch_size, n_real, kernel_num, use_chain):
    """One (i, j) tile of the n x n pair matrix.

    inv_bw_ref: (kernel_num,) f32 in SMEM   precomputed 1 / (bandwidth_k + 1e-6)
    x_ref     : (TM, Dp) f32                row block i of the (padded) total matrix
    y_ref     : (TN, Dp) f32                row block j of the (padded) total matrix
    xn_ref    : (TM, 1)  f32                squared row norms, column layout
    yn_ref    : (1, TN)  f32                squared row norms, row (lane) layout
    out_ref   : (1, 1, TN) f32              lane-dense per-i partial sums, resident
                                            across the j (reduction) axis
    """
    i = pl.program_id(0)
    j = pl.program_id(1)
    tm = x_ref.shape[0]
    tn = y_ref.shape[0]

    @pl.when(j == 0)
    def _init():
        out_ref[...] = jnp.zeros_like(out_ref)

    # Gram symmetry: the pair matrix is symmetric, so lower-triangle tiles (j < i)
    # are skipped and off-diagonal tiles are counted twice.
    @pl.when(j >= i)
    def _body():
        x = x_ref[...]
        y = y_ref[...]

        # Gram block on the MXU, contracting the feature axis of both operands
        # (no explicit transpose through the XLU).
        gram = lax.dot_general(x, y, dimension_numbers=(((1,), (1,)), ((), ())),
                               preferred_element_type=jnp.float32)        # (TM, TN)

        # Pairwise squared distances from precomputed row norms; clamp tiny negative
        # fp-cancellation residue (free VALU op).
        l2 = xn_ref[...] + yn_ref[...] - 2.0 * gram
        neg_l2 = -jnp.maximum(l2, 0.0)

        if use_chain:
            # kernel_mul == 2: one exp per element (largest bandwidth / smallest
            # inverse), remaining kernels via repeated squaring (VALU-only).
            e = jnp.exp(neg_l2 * inv_bw_ref[kernel_num - 1])
            ksum = e
            for _ in range(kernel_num - 1):
                e = e * e
                ksum = ksum + e
        else:
            ksum = jnp.exp(neg_l2 * inv_bw_ref[0])
            for k in range(1, kernel_num):
                ksum = ksum + jnp.exp(neg_l2 * inv_bw_ref[k])

        # Rank-1 sign weights: +1 source rows, -1 target rows, 0 padded rows.
        # O(TM + TN) work instead of full-tile iotas/selects.
        row_ids = i * tm + lax.broadcasted_iota(jnp.int32, (tm, 1), 0)
        col_ids = j * tn + lax.broadcasted_iota(jnp.int32, (1, tn), 1)

        def _sign(ids):
            return jnp.where(ids < batch_size, 1.0,
                             jnp.where(ids < n_real, -1.0, 0.0)).astype(jnp.float32)

        sign_row = _sign(row_ids)                                        # (TM, 1)
        sign_col = _sign(col_ids)                                        # (1, TN)

        # One full-tile multiply + one sublane reduce; sign_col applied to the
        # already-reduced (1, TN) row, then accumulate into the resident output.
        rowsum = jnp.sum(ksum * sign_row, axis=0, keepdims=True)         # (1, TN)
        scale = jnp.where(j == i, 1.0, 2.0).astype(jnp.float32)
        out_ref[...] += (scale * (rowsum * sign_col))[None, :, :]


def mmd_loss(source, target, kernel_mul=2.0, kernel_num=5, tile=256):
    """Gaussian multi-kernel MMD loss (forward of MMD_Loss, kernel='guassian')."""
    assert source.ndim == 2 and source.shape == target.shape
    b, d = source.shape
    n = 2 * b
    kernel_mul = float(kernel_mul)
    kernel_num = int(kernel_num)
    use_chain = (kernel_mul == 2.0)   # squaring chain only valid for an exact 2x ladder

    src = source.astype(jnp.float32)
    tgt = target.astype(jnp.float32)

    # ---- bandwidth via the closed form  sum(L2) = 2*n*S - 2*||sum_i t_i||^2  (O(nD)) ----
    # (f32 cancellation-prone for huge n*D; fine at these scales.)
    sum_sq = jnp.sum(src * src) + jnp.sum(tgt * tgt)
    col_sum = jnp.sum(src, axis=0) + jnp.sum(tgt, axis=0)
    sum_l2 = 2.0 * n * sum_sq - 2.0 * jnp.sum(col_sum * col_sum)
    bandwidth = sum_l2 / float(n * n - n)
    bandwidth = bandwidth / (kernel_mul ** (kernel_num // 2))
    bw = bandwidth * (kernel_mul ** jnp.arange(kernel_num, dtype=jnp.float32))
    inv_bw = 1.0 / (bw + 1e-6)                      # (kernel_num,) f32 -> SMEM operand

    # ---- tiling ----
    d_pad = _round_up(max(d, 1), 128)
    if n <= 256:
        # Single 8-aligned tile (overhead-bound path). On v7x this 1x1 grid uses one
        # TensorCore; acceptable for small n.
        tile_rows = _round_up(n, 8)
    else:
        tile = max(int(tile), 128)
        candidates = sorted({tile, 128}, reverse=True)
        # Minimize padded-row waste; prefer the larger tile on ties.
        tile_rows = min(candidates, key=lambda t: (_round_up(n, t) - n, -t))
        # Keep the two double-buffered (tile_rows, d_pad) row blocks well under the
        # v7x 64 MiB physical VMEM (32 MiB scoped default) for wide features.
        while tile_rows > 128 and 4 * tile_rows * d_pad * 4 > 16 * 1024 * 1024:
            tile_rows //= 2

    n_pad = _round_up(n, tile_rows)
    gi = n_pad // tile_rows

    # Padded "total" = [source; target; zeros]. Zero feature-padding keeps the Gram /
    # norms exact; zero row-padding is masked out by the sign weights in the kernel.
    total = jnp.zeros((n_pad, d_pad), jnp.float32)
    total = total.at[:b, :d].set(src)
    total = total.at[b:n, :d].set(tgt)

    rnorm = jnp.sum(total * total, axis=1)
    rnorm_col = rnorm[:, None]                      # (n_pad, 1)
    rnorm_row = rnorm[None, :]                      # (1, n_pad)

    kernel = functools.partial(
        _mmd_tile_kernel,
        batch_size=b,
        n_real=n,
        kernel_num=kernel_num,
        use_chain=use_chain,
    )

    num_tiles = gi * (gi + 1) // 2                  # upper triangle incl. diagonal
    tile_elems = tile_rows * tile_rows
    cost = pl.CostEstimate(
        flops=num_tiles * (2 * tile_elems * d_pad + 8 * tile_elems),
        transcendentals=num_tiles * tile_elems * (1 if use_chain else kernel_num),
        bytes_accessed=4 * (gi * tile_rows * d_pad            # i-side row blocks
                            + gi * gi * tile_rows * d_pad     # j-side row blocks
                            + 2 * n_pad                       # row norms
                            + gi * tile_rows),                # partial-sum outputs
    )

    partials = pl.pallas_call(
        kernel,
        out_shape=jax.ShapeDtypeStruct((gi, 1, tile_rows), jnp.float32),
        grid=(gi, gi),
        in_specs=[
            pl.BlockSpec(memory_space=pltpu.MemorySpace.SMEM),           # inverse bandwidths
            pl.BlockSpec((tile_rows, d_pad), lambda i, j: (i, 0)),       # row block (i side)
            pl.BlockSpec((tile_rows, d_pad), lambda i, j: (j, 0)),       # row block (j side)
            pl.BlockSpec((tile_rows, 1), lambda i, j: (i, 0)),           # row norms (col layout)
            pl.BlockSpec((1, tile_rows), lambda i, j: (0, j)),           # row norms (row layout)
        ],
        out_specs=pl.BlockSpec((1, 1, tile_rows), lambda i, j: (i, 0, 0)),
        compiler_params=pltpu.CompilerParams(
            dimension_semantics=("parallel", "arbitrary"),
            vmem_limit_bytes=32 * 1024 * 1024,
        ),
        cost_estimate=cost,
    )(inv_bw, total, total, rnorm_col, rnorm_row)

    # Padded lanes / skipped lower-triangle tiles contribute exact zeros.
    return jnp.sum(partials) / float(b * b)


def _mmd_loss_reference(source, target, kernel_mul=2.0, kernel_num=5):
    """Pure-JAX reference mirroring the PyTorch module, for validation."""
    b = source.shape[0]
    total = jnp.concatenate([source, target], axis=0).astype(jnp.float32)
    n = total.shape[0]
    diff = total[None, :, :] - total[:, None, :]
    l2 = jnp.sum(diff * diff, axis=2)
    bandwidth = jnp.sum(l2) / (n * n - n)
    bandwidth = bandwidth / (kernel_mul ** (kernel_num // 2))
    kval = sum(jnp.exp(-l2 / (bandwidth * kernel_mul ** i + 1e-6))
               for i in range(kernel_num))
    xx = kval[:b, :b]
    yy = kval[b:, b:]
    xy = kval[:b, b:]
    yx = kval[b:, :b]
    return jnp.mean(xx + yy - xy - yx)


if __name__ == "__main__":
    # MMD_Loss has no learnable parameters (kernel_mul=2.0, kernel_num=5).
    key = jax.random.PRNGKey(0)
    k_src, k_tgt, k_src2, k_tgt2 = jax.random.split(key, 4)

    # Small case (single-tile / overhead-bound path), shapes implied by the module.
    B, D = 8, 32
    source = jax.random.normal(k_src, (B, D), dtype=jnp.float32)
    target = jax.random.normal(k_tgt, (B, D), dtype=jnp.float32) + 0.5

    loss = jax.block_until_ready(mmd_loss(source, target))
    ref = jax.block_until_ready(_mmd_loss_reference(source, target))
    assert jnp.allclose(loss, ref, rtol=2e-3, atol=1e-4), (loss, ref)

    # Larger case exercising the tiled grid, symmetry skip, and row/feature padding
    # (n = 320 -> adaptive tile_rows = 128 -> 3x3 grid, 6 computed tiles).
    B2, D2 = 160, 72
    source2 = jax.random.normal(k_src2, (B2, D2), dtype=jnp.float32)
    target2 = jax.random.normal(k_tgt2, (B2, D2), dtype=jnp.float32) + 0.25

    loss2 = jax.block_until_ready(mmd_loss(source2, target2))
    ref2 = jax.block_until_ready(_mmd_loss_reference(source2, target2))
    assert jnp.allclose(loss2, ref2, rtol=2e-3, atol=1e-4), (loss2, ref2)

    print("KERNEL_OK")
</pallas_src>

<mosaic_0001>
module attributes {stable_mosaic.version = 11 : i64} {
  func.func @_mmd_tile_kernel(%arg0: i32, %arg1: i32, %arg2: memref<5xf32, #tpu.memory_space<smem>>, %arg3: memref<16x128xf32, #tpu.memory_space<vmem>>, %arg4: memref<16x128xf32, #tpu.memory_space<vmem>>, %arg5: memref<16x1xf32, #tpu.memory_space<vmem>>, %arg6: memref<1x16xf32, #tpu.memory_space<vmem>>, %arg7: memref<1x1x16xf32, #tpu.memory_space<vmem>>) attributes {dimension_semantics = [#tpu.dimension_semantics<parallel>, #tpu.dimension_semantics<arbitrary>], iteration_bounds = array<i64: 1, 1>, scalar_prefetch = 0 : i64, scratch_operands = 0 : i64, tpu.core_type = #tpu.core_type<tc>, window_params = [{transform_indices = @transform_0, window_bounds = array<i64: 5>}, {transform_indices = @transform_1, window_bounds = array<i64: 16, 128>}, {transform_indices = @transform_2, window_bounds = array<i64: 16, 128>}, {transform_indices = @transform_3, window_bounds = array<i64: 16, 1>}, {transform_indices = @transform_4, window_bounds = array<i64: 1, 16>}, {transform_indices = @transform_5, window_bounds = array<i64: 1, 1, 16>}]} {
    %c0_i32 = arith.constant 0 : i32
    %0 = arith.cmpi eq, %arg1, %c0_i32 : i32
    %1 = arith.extui %0 : i1 to i32
    %c0_i32_0 = arith.constant 0 : i32
    %2 = arith.cmpi ne, %1, %c0_i32_0 : i32
    scf.if %2 {
      %cst = arith.constant 0.000000e+00 : f32
      %6 = vector.broadcast %cst : f32 to vector<1x1x16xf32>
      %c0 = arith.constant 0 : index
      %c0_2 = arith.constant 0 : index
      %c0_3 = arith.constant 0 : index
      %7 = vector.load %arg7[%c0, %c0_2, %c0_3] : memref<1x1x16xf32, #tpu.memory_space<vmem>>, vector<1x1x16xf32>
      tpu.vector_store %arg7[%c0, %c0_2, %c0_3], %6 {strides = array<i32>} : memref<1x1x16xf32, #tpu.memory_space<vmem>>, vector<1x1x16xf32>,
    } else {
    }
    %3 = arith.cmpi sge, %arg1, %arg0 : i32
    %4 = arith.extui %3 : i1 to i32
    %c0_i32_1 = arith.constant 0 : i32
    %5 = arith.cmpi ne, %4, %c0_i32_1 : i32
    scf.if %5 {
      %c0 = arith.constant 0 : index
      %c0_2 = arith.constant 0 : index
      %6 = vector.load %arg3[%c0, %c0_2] : memref<16x128xf32, #tpu.memory_space<vmem>>, vector<16x128xf32>
      %c0_3 = arith.constant 0 : index
      %c0_4 = arith.constant 0 : index
      %7 = vector.load %arg4[%c0_3, %c0_4] : memref<16x128xf32, #tpu.memory_space<vmem>>, vector<16x128xf32>
      %cst = arith.constant dense<0.000000e+00> : vector<16x16xf32>
      %8 = tpu.matmul %6, %7, %cst {dimension_numbers = #tpu.dot_dimension_numbers<[1], [1], [0], [0], [0, 0, 1, 0], [], []>} : vector<16x128xf32>, vector<16x128xf32>, vector<16x16xf32> -> vector<16x16xf32>
      %c0_5 = arith.constant 0 : index
      %c0_6 = arith.constant 0 : index
      %9 = vector.load %arg5[%c0_5, %c0_6] : memref<16x1xf32, #tpu.memory_space<vmem>>, vector<16x1xf32>
      %c0_7 = arith.constant 0 : index
      %c0_8 = arith.constant 0 : index
      %10 = vector.load %arg6[%c0_7, %c0_8] : memref<1x16xf32, #tpu.memory_space<vmem>>, vector<1x16xf32>
      %11 = vector.broadcast %9 : vector<16x1xf32> to vector<16x16xf32>
      %12 = vector.broadcast %10 : vector<1x16xf32> to vector<16x16xf32>
      %13 = arith.addf %11, %12 : vector<16x16xf32>
      %cst_9 = arith.constant 2.000000e+00 : f32
      %14 = vector.broadcast %cst_9 : f32 to vector<16x16xf32>
      %15 = arith.mulf %14, %8 : vector<16x16xf32>
      %16 = arith.subf %13, %15 : vector<16x16xf32>
      %cst_10 = arith.constant 0.000000e+00 : f32
      %17 = vector.broadcast %cst_10 : f32 to vector<16x16xf32>
      %18 = arith.maximumf %16, %17 : vector<16x16xf32>
      %cst_11 = arith.constant 0.000000e+00 : f32
      %19 = vector.broadcast %cst_11 : f32 to vector<16x16xf32>
      %20 = arith.subf %19, %18 : vector<16x16xf32>
      %c4 = arith.constant 4 : index
      %21 = memref.load %arg2[%c4] : memref<5xf32, #tpu.memory_space<smem>>
      %22 = vector.broadcast %21 : f32 to vector<16x16xf32>
      %23 = arith.mulf %20, %22 : vector<16x16xf32>
      %24 = math.exp %23 : vector<16x16xf32>
      %25 = arith.mulf %24, %24 : vector<16x16xf32>
      %26 = arith.addf %24, %25 : vector<16x16xf32>
      %27 = arith.mulf %25, %25 : vector<16x16xf32>
      %28 = arith.addf %26, %27 : vector<16x16xf32>
      %29 = arith.mulf %27, %27 : vector<16x16xf32>
      %30 = arith.addf %28, %29 : vector<16x16xf32>
      %31 = arith.mulf %29, %29 : vector<16x16xf32>
      %32 = arith.addf %30, %31 : vector<16x16xf32>
      %c16_i32 = arith.constant 16 : i32
      %33 = arith.muli %arg0, %c16_i32 : i32
      %34 = tpu.iota {dimensions = array<i32: 0>} : vector<16x1xi32>
      %35 = vector.broadcast %33 : i32 to vector<16x1xi32>
      %36 = arith.addi %35, %34 : vector<16x1xi32>
      %c16_i32_12 = arith.constant 16 : i32
      %37 = arith.muli %arg1, %c16_i32_12 : i32
      %38 = tpu.iota {dimensions = array<i32: 1>} : vector<1x16xi32>
      %39 = vector.broadcast %37 : i32 to vector<1x16xi32>
      %40 = arith.addi %39, %38 : vector<1x16xi32>
      %c8_i32 = arith.constant 8 : i32
      %41 = vector.broadcast %c8_i32 : i32 to vector<16x1xi32>
      %42 = arith.cmpi slt, %36, %41 : vector<16x1xi32>
      %c16_i32_13 = arith.constant 16 : i32
      %43 = vector.broadcast %c16_i32_13 : i32 to vector<16x1xi32>
      %44 = arith.cmpi slt, %36, %43 : vector<16x1xi32>
      %cst_14 = arith.constant -1.000000e+00 : f32
      %cst_15 = arith.constant 0.000000e+00 : f32
      %45 = vector.broadcast %cst_14 : f32 to vector<16x1xf32>
      %46 = vector.broadcast %cst_15 : f32 to vector<16x1xf32>
      %47 = arith.select %44, %45, %46 : vector<16x1xi1>, vector<16x1xf32>
      %cst_16 = arith.constant 1.000000e+00 : f32
      %48 = vector.broadcast %cst_16 : f32 to vector<16x1xf32>
      %49 = arith.select %42, %48, %47 : vector<16x1xi1>, vector<16x1xf32>
      %c8_i32_17 = arith.constant 8 : i32
      %50 = vector.broadcast %c8_i32_17 : i32 to vector<1x16xi32>
      %51 = arith.cmpi slt, %40, %50 : vector<1x16xi32>
      %c16_i32_18 = arith.constant 16 : i32
      %52 = vector.broadcast %c16_i32_18 : i32 to vector<1x16xi32>
      %53 = arith.cmpi slt, %40, %52 : vector<1x16xi32>
      %cst_19 = arith.constant -1.000000e+00 : f32
      %cst_20 = arith.constant 0.000000e+00 : f32
      %54 = vector.broadcast %cst_19 : f32 to vector<1x16xf32>
      %55 = vector.broadcast %cst_20 : f32 to vector<1x16xf32>
      %56 = arith.select %53, %54, %55 : vector<1x16xi1>, vector<1x16xf32>
      %cst_21 = arith.constant 1.000000e+00 : f32
      %57 = vector.broadcast %cst_21 : f32 to vector<1x16xf32>
      %58 = arith.select %51, %57, %56 : vector<1x16xi1>, vector<1x16xf32>
      %59 = vector.broadcast %49 : vector<16x1xf32> to vector<16x16xf32>
      %60 = arith.mulf %32, %59 : vector<16x16xf32>
      %cst_22 = arith.constant dense<0.000000e+00> : vector<16xf32>
      %61 = vector.multi_reduction <add>, %60, %cst_22 [0] : vector<16x16xf32> to vector<16xf32>
      %62 = vector.shape_cast %61 : vector<16xf32> to vector<1x16xf32>
      %63 = arith.cmpi eq, %arg1, %arg0 : i32
      %cst_23 = arith.constant 1.000000e+00 : f32
      %cst_24 = arith.constant 2.000000e+00 : f32
      %64 = arith.select %63, %cst_23, %cst_24 : f32
      %c0_25 = arith.constant 0 : index
      %c0_26 = arith.constant 0 : index
      %c0_27 = arith.constant 0 : index
      %65 = vector.load %arg7[%c0_25, %c0_26, %c0_27] : memref<1x1x16xf32, #tpu.memory_space<vmem>>, vector<1x1x16xf32>
      %66 = arith.mulf %62, %58 : vector<1x16xf32>
      %67 = vector.broadcast %64 : f32 to vector<1x16xf32>
      %68 = arith.mulf %67, %66 : vector<1x16xf32>
      %69 = vector.shape_cast %68 : vector<1x16xf32> to vector<1x1x16xf32>
      %70 = arith.addf %65, %69 : vector<1x1x16xf32>
      %c0_28 = arith.constant 0 : index
      %c0_29 = arith.constant 0 : index
      %c0_30 = arith.constant 0 : index
      %71 = vector.load %arg7[%c0_28, %c0_29, %c0_30] : memref<1x1x16xf32, #tpu.memory_space<vmem>>, vector<1x1x16xf32>
      tpu.vector_store %arg7[%c0_28, %c0_29, %c0_30], %70 {strides = array<i32>} : memref<1x1x16xf32, #tpu.memory_space<vmem>>, vector<1x1x16xf32>,
    } else {
    }
    return
  }
  func.func @transform_0(%arg0: i32, %arg1: i32) -> i32 {
    %c0_i32 = arith.constant 0 : i32
    %c0_i32_0 = arith.constant 0 : i32
    return %c0_i32 : i32
  }
  func.func @transform_1(%arg0: i32, %arg1: i32) -> (i32, i32) {
    %c0_i32 = arith.constant 0 : i32
    %c0_i32_0 = arith.constant 0 : i32
    return %arg0, %c0_i32 : i32, i32
  }
  func.func @transform_2(%arg0: i32, %arg1: i32) -> (i32, i32) {
    %c0_i32 = arith.constant 0 : i32
    %c0_i32_0 = arith.constant 0 : i32
    return %arg1, %c0_i32 : i32, i32
  }
  func.func @transform_3(%arg0: i32, %arg1: i32) -> (i32, i32) {
    %c0_i32 = arith.constant 0 : i32
    %c0_i32_0 = arith.constant 0 : i32
    return %arg0, %c0_i32 : i32, i32
  }
  func.func @transform_4(%arg0: i32, %arg1: i32) -> (i32, i32) {
    %c0_i32 = arith.constant 0 : i32
    %c0_i32_0 = arith.constant 0 : i32
    return %c0_i32, %arg1 : i32, i32
  }
  func.func @transform_5(%arg0: i32, %arg1: i32) -> (i32, i32, i32) {
    %c0_i32 = arith.constant 0 : i32
    %c0_i32_0 = arith.constant 0 : i32
    %c0_i32_1 = arith.constant 0 : i32
    return %arg0, %c0_i32, %c0_i32_0 : i32, i32, i32
  }
}

</mosaic_0001>

<bundles_post_ra>
// kernel: tpu_custom_call.1
= control target key start
LH: loop header
LB: loop body
LE: loop exit
PB: predicated region body
PF: predicated region fallthrough
CT: control target
= control target key end

     0   :  { %10 = vsyncpa [#allocation5], 0  ;;  %s345_s0 = inlined_call_operand.vmem [shape: f32[5], index: 0, kind: input, shape index: {}]   ;;  %s346_s1 = inlined_call_operand.vmem [shape: f32[16,128], index: 1, kind: input, shape index: {}]   ;;  %s347_s2 = inlined_call_operand.hbm [shape: f32[16,128], index: 2, kind: input, shape index: {}]   ;;  %s348_s3 = inlined_call_operand.vmem [shape: f32[16,1], index: 3, kind: input, shape index: {}]   ;;  %s349_s4 = inlined_call_operand.vmem [shape: f32[1,16], index: 4, kind: input, shape index: {}]   ;;  %s350_s5 = inlined_call_operand.hbm [shape: f32[1,1,16], index: 5, kind: output, shape index: {}]  }
   0x1   :  { %11 = vsyncpa [#allocation3], 0 }
   0x2   :  { %12 = vsyncpa [#allocation4], 0  ;;  %s18_s20 = sshll.u32 %s345_s0, 4  ;;  %s28_s23 = sshll.u32 %s347_s2, 4  ;;  %s19_s20 = int_to_ptr.vmem [resolvable:$true] %s18_s20  ;;  %s29_s23 = int_to_ptr.hbm [resolvable:$true] %s28_s23 }
   0x3   :  { %s282_s24 = smov [#allocation2]   ;;  %s283_s25 = smov [#allocation6]  }
   0x4   :  { %21 = dma.vmem_to_smem %s19_s20, 16, %s282_s24, [#allocation5]  }
   0x5   :  { %s30_s26 = sshll.u32 %s283_s25, 4  ;;  %s284_s27 = smov 128   ;;  %s31_s26 = int_to_ptr.vmem [resolvable:$true] %s30_s26 }
   0x6   :  { %s285_s28 = smov 8  }
   0x7   :  { %36 = dma.hbm_to_vmem [thread:$0]  %s29_s23, 256, %s31_s26, [#allocation3], %s284_s27, %s284_s27, %s285_s28  }
   0x8   :  { %276 = dma.done.wait [#allocation5], 16  }
   0x9   :  { %277 = vsyncadd [#allocation5], 4294967280 }
   0xa   :  { %278 = dma.done.wait [#allocation3], 256  }
   0xb   :  { %279 = vsyncadd [#allocation3], 4294967040 }
   0xc   :  { %49 = sfence }
   0xd   :  { %v63_v0 = vld [vmem:[#allocation6 + $0x8] sm:$0xff]  ;;  %v286_v2 = vmov 0   ;;  %v62_v3 = vld [vmem:[#allocation6] sm:$0xff]  ;;  %s200_s12 = sld [smem:[#allocation2 + $0x4]]  ;;  %vm54_vm0 = vcmask 122880   ;;  %v287_v12 = vmov 0.0   ;;  %v145_v47 = vlaneseq }
   0xe   :  { %v88_v1 = vld [vmem:[%s348_s3 + $0x8] sm:$0xff]  ;;  %78 = vmatpush.xpose.msra.mxu0 %v63_v0  ;;  %201 = vmatpush.xpose.msra.mxu1 %v63_v0  ;;  %v60_v4 = vld [vmem:[%s346_s1] sm:$0xff]  ;;  %55 = vst.msk [vmem:[#allocation7] sm:$0x1] %vm54_vm0, %v287_v12  ;;  %vm163_vm1 = vcmask 130048   ;;  %s189_s14 = sshll.u32 %s350_s5, 4  ;;  %s190_s14 = int_to_ptr.hbm [resolvable:$true] %s189_s14 }
   0xf   :  { %210 = vset.pattern.permute.xlu0 %v286_v2  ;;  %v61_v5 = vld [vmem:[%s346_s1 + $0x8] sm:$0xff]  ;;  %v87_v6 = vld [vmem:[%s348_s3] sm:$0xff]  ;;  %v146_v51 = vand.u32 127, %v145_v47  ;;  %s288_s1 = smov [#allocation7]  }
  0x10   :  { %97 = vperm.xlu0 %210, %v88_v1   ;;  %v211_v8 = vld [vmem:[%s349_s4] ss:$0 sm:$0xff]  ;;  %s187_s3 = sshll.u32 %s288_s1, 4  ;;  %s188_s3 = int_to_ptr.vmem [resolvable:$true] %s187_s3 }
  0x11   :  { %vm158_vm2 = vcmp.lt.s32.totalorder %v146_v51, 16  ;;  %vm157_vm3 = vcmp.lt.s32.totalorder %v146_v51, 8 }
  0x12   :  { %79 = vmatpush.xpose.msra.mxu0 %v62_v3  ;;  %202 = vmatpush.xpose.msra.mxu1 %v62_v3  ;;  %v159_v55 = vsel %vm158_vm2, -1.0, %v287_v12 }
  0x13   :  { %v114_v21 = vstv %s200_s12  ;;  %v160_v58 = vsel %vm157_vm3, 1.0, %v159_v55 }
  0x15   :  { %80 = vmatmul.f32.vlgmr.msra.gmra.mxu0 %v60_v4  ;;  %83 = vmatmul.f32.vlgmr.msra.gmra.mxu1 %v61_v5  ;;  %v175_v60 = vld [vmem:[#allocation7] sm:$0x1] }
  0x18   :  { %92 = vperm.xlu0 %210, %v87_v6  }
  0x82   :  { %v98_v7 = vpop.permute.xlu0 %97 }
  0x83   :  { %v104_v13 = vadd.f32 %v211_v8, %v98_v7 }
  0x8a   :  { %v93_v9 = vpop.permute.xlu0 %92 }
  0x8b   :  { %v103_v14 = vadd.f32 %v211_v8, %v93_v9 }
  0x92   :  { %v81_v10 = vpop.f32.mrf.mxu0  ;;  %v84_v11 = vpop.f32.mrf.mxu1 }
  0x93   :  { %v105_v15 = vmul.f32 2.0, %v81_v10  ;;  %v106_v16 = vmul.f32 2.0, %v84_v11 }
  0x95   :  { %v107_v17 = vsub.f32 %v103_v14, %v105_v15  ;;  %v108_v18 = vsub.f32 %v104_v13, %v106_v16 }
  0x97   :  { %v109_v19 = vmax.f32 %v107_v17, 0.0  ;;  %v110_v20 = vmax.f32 %v108_v18, 0.0 }
  0x99   :  { %v111_v22 = vsub.f32 0.0, %v109_v19  ;;  %v112_v23 = vsub.f32 0.0, %v110_v20 }
  0x9b   :  { %v115_v24 = vmul.f32 %v114_v21, %v111_v22  ;;  %v116_v25 = vmul.f32 %v114_v21, %v112_v23 }
  0x9d   :  { %v117_v26 = vmul.f32 1.442695, %v115_v24  ;;  %v119_v27 = vmul.f32 1.442695, %v116_v25 }
  0x9f   :  { %212 = vpow2.f32 %v117_v26 }
  0xa0   :  { %214 = vpow2.f32 %v119_v27 }
  0xa5   :  { %v213_v28 = vpop.eup %212 }
  0xa6   :  { %v215_v29 = vpop.eup %214  ;;  %v121_v30 = vmul.f32 %v213_v28, %v213_v28 }
  0xa7   :  { %v122_v31 = vmul.f32 %v215_v29, %v215_v29 }
  0xa8   :  { %v123_v32 = vadd.f32 %v213_v28, %v121_v30  ;;  %v125_v33 = vmul.f32 %v121_v30, %v121_v30 }
  0xa9   :  { %v124_v34 = vadd.f32 %v215_v29, %v122_v31  ;;  %v126_v35 = vmul.f32 %v122_v31, %v122_v31 }
  0xaa   :  { %v127_v36 = vadd.f32 %v125_v33, %v123_v32  ;;  %v129_v37 = vmul.f32 %v125_v33, %v125_v33 }
  0xab   :  { %v128_v38 = vadd.f32 %v126_v35, %v124_v34  ;;  %v130_v39 = vmul.f32 %v126_v35, %v126_v35 }
  0xac   :  { %v131_v40 = vadd.f32 %v129_v37, %v127_v36  ;;  %v133_v41 = vmul.f32 %v129_v37, %v129_v37 }
  0xad   :  { %v132_v42 = vadd.f32 %v130_v39, %v128_v38  ;;  %v134_v43 = vmul.f32 %v130_v39, %v130_v39 }
  0xae   :  { %v135_v44 = vadd.f32 %v133_v41, %v131_v40 }
  0xaf   :  { %v136_v45 = vadd.f32 %v134_v43, %v132_v42 }
  0xb0   :  { %v164_v48 = vsel %vm163_vm1, %v135_v44, 0.0 }
  0xb1   :  { %v162_v46 = vmul.f32 -1.0, %v136_v45 }
  0xb3   :  { %v165_v49 = vsel %vm163_vm1, %v162_v46, 0.0 }
  0xb4   :  { %v166_v50 = vadd.f32 %v165_v49, %v164_v48 }
  0xb6   :  { %v167_v52 = vrot.slane %v166_v50, 4 }
  0xb8   :  { %v168_v53 = vadd.f32 %v167_v52, %v166_v50 }
  0xba   :  { %v169_v54 = vrot.slane %v168_v53, 2 }
  0xbc   :  { %v170_v56 = vadd.f32 %v169_v54, %v168_v53 }
  0xbe   :  { %v171_v57 = vrot.slane %v170_v56, 1 }
  0xc0   :  { %v172_v59 = vadd.f32 %v171_v57, %v170_v56 }
  0xc2   :  { %v176_v61 = vmul.f32 %v172_v59, %v160_v58 }
  0xc4   :  { %v179_v62 = vadd.f32 %v176_v61, %v175_v60 }
  0xc6   :  { %181 = vst.msk [vmem:[#allocation7] sm:$0x1] %vm54_vm0, %v179_v62 }
  0xc7   :  { %192 = dma.vmem_to_hbm [thread:$0]  %s188_s3, 16, %s190_s14, [#allocation4]  }
  0xc8   :  { %280 = dma.done.wait [#allocation4], 16  }
  0xc9   :  { %281 = vsyncadd [#allocation4], 4294967280 }
  0xca   :  { %197 = vsyncpa [#allocation3], 1 }
  0xcb   :  { %198 = vsyncpa [#allocation4], 1 }
  0xcc   :  { %199 = vsyncpa [#allocation5], 1 }

</bundles_post_ra>
